<compile_context>
chip_gen: v6e
topology: v6e:2x2x1
jax: 0.10.0
libtpu: 0.0.40
codegen_flags: <defaults>
</compile_context>

<pallas_src>
import functools

import jax
import jax.numpy as jnp
from jax.experimental import pallas as pl
from jax.experimental.pallas import tpu as pltpu


def _round_up(x, m):
    return (x + m - 1) // m * m


def _cdiv(a, b):
    return (a + b - 1) // b


def charcnn_kernel(ids_ref, w_ref, b_ref, o_ref, *, h):
    """Fused gather + conv(k=3) + conv(k=4) + Tanh + full-length max-pool + concat.

    ids_ref : (tile_n, C+3) int32  spatially padded char ids (pad sentinel = 4*V)
    w_ref   : (4*V, OW)    f32     embedding folded into both convs' taps, OW=128-padded
    b_ref   : (1, OW)      f32     [b3 | b4 | 0...]
    o_ref   : (tile_n, OW) f32     [max(tanh(conv3)) | max(tanh(conv4)) | 0...]
    h       : static int           hidden_dim (conv3 half width)
    """
    tn, lp = ids_ref.shape
    kv, ow = w_ref.shape
    v = kv // 4
    c = lp - 3                           # real char length

    ids = ids_ref[...]                   # (tn, C+3) int32
    w = w_ref[...]                       # (4V, OW)  VMEM-resident across the grid
    b = b_ref[...]                       # (1, OW)

    # Hoisted lane-broadcasts: each padded id column is broadcast across the kv
    # lanes exactly once and reused by every (position, tap) pair that reads it.
    id_b = [jnp.broadcast_to(ids[:, col:col + 1], (tn, kv)) for col in range(lp)]

    # Loop-invariant shifted iotas: tap j of the folded weight owns id range
    # [j*V, (j+1)*V); "iota - j*V == id" selects it with a single compare.
    base_iota = jax.lax.broadcasted_iota(jnp.int32, (tn, kv), 1)
    iota_j = [base_iota - j * v for j in range(4)]

    col_idx = jax.lax.broadcasted_iota(jnp.int32, (tn, ow), 1)

    # Running max over the PRE-activation; tanh(. + b) is monotone, so bias add
    # and tanh happen once in the epilogue.  Floor must be "-huge", not -2.
    m = jnp.full((tn, ow), -3.0e38, dtype=jnp.float32)

    # TODO(synk): for production char lengths C >> 16, replace this fully unrolled
    # static loop with lax.fori_loop(unroll=2..4) + a peeled (masked) last iteration
    # to bound vreg live ranges.
    for l in range(c):
        # One-hot over the 4 taps of both branches (disjoint id ranges -> OR).
        # The pad sentinel (4*V) never matches any shifted iota, so spatial zero
        # padding falls out for free (all-zero one-hot row == zero conv column).
        hit = iota_j[0] == id_b[l]
        for j in range(1, 4):
            hit = jnp.logical_or(hit, iota_j[j] == id_b[l + j])
        oh = hit.astype(jnp.float32)                                 # (tn, 4V)

        # All 4 taps of both conv branches in one flat MXU matmul.
        z = jnp.dot(oh, w, preferred_element_type=jnp.float32)       # (tn, OW)

        if l == c - 1:
            # conv4 (pad=1) only has C-1 output positions: the last position
            # contributes to the conv3 half (first H columns) only.
            # NOTE: if C == 1 the conv4 half is undefined in the reference too
            # (empty max-pool); the kernel emits tanh(-huge + b) = -1 there.
            m = jnp.where(col_idx < h, jnp.maximum(m, z), m)
        else:
            m = jnp.maximum(m, z)

    o_ref[...] = jnp.tanh(m + b).astype(o_ref.dtype)


@functools.partial(jax.jit, static_argnames=("tile_n",))
def charcnn_forward(x_ids, emb, w3, b3, w4, b4, *, tile_n=2048):
    """x_ids: (B, S, C) int32 char indices. Returns (B, S, 2*H) float32."""
    B, S, C = x_ids.shape
    N = B * S
    V, E = emb.shape
    H = w3.shape[2]
    two_h = 2 * H
    ow = _round_up(two_h, 128)           # lane-dense output width (unmasked stores)

    # ---- fold the embedding table into the conv weights (tiny, one-off) ----
    #   W_eff[j*V + v, :H] = emb[v] @ w3[j]   (j < 3, tap 3 zero-padded)
    #   W_eff[j*V + v, H:2H] = emb[v] @ w4[j]
    w3z = jnp.concatenate([w3, jnp.zeros((1, E, H), w3.dtype)], axis=0)    # (4,E,H)
    w34 = jnp.concatenate([w3z, w4], axis=-1)                              # (4,E,2H)
    w_eff = jnp.einsum("ve,keh->kvh",
                       emb.astype(jnp.float32), w34.astype(jnp.float32),
                       precision=jax.lax.Precision.HIGHEST)                # (4,V,2H)
    w_eff = w_eff.reshape(4 * V, two_h)
    # Kept f32: kernel is VALU-bound; bf16 weights would cost ~1e-3 accuracy.
    w_pad = jnp.zeros((4 * V, ow), jnp.float32).at[:, :two_h].set(w_eff)
    b_eff = jnp.concatenate([b3, b4], axis=-1).astype(jnp.float32)         # (1,2H)
    b_pad = jnp.zeros((1, ow), jnp.float32).at[:, :two_h].set(b_eff)

    # ---- tiling: big row tiles, EVEN block count (v7x has 2 TCs on the
    #      parallel axis), tile re-derived from the block count to keep the
    #      row-padding waste small ----
    tn0 = max(8, _round_up(min(tile_n, max(N, 1)), 8))
    n_blocks = _round_up(max(2, _cdiv(N, tn0)), 2)
    tn = max(8, _round_up(_cdiv(N, n_blocks), 8))
    n_pad = n_blocks * tn

    # ---- spatial pad (left 1 / right 2) + row pad, all with the sentinel id ----
    sentinel = 4 * V                     # never matches any folded-weight row
    ids = jnp.full((n_pad, C + 3), sentinel, dtype=jnp.int32)
    ids = ids.at[:N, 1:C + 1].set(x_ids.reshape(N, C).astype(jnp.int32))

    out = pl.pallas_call(
        functools.partial(charcnn_kernel, h=H),
        out_shape=jax.ShapeDtypeStruct((n_pad, ow), jnp.float32),
        grid_spec=pltpu.PrefetchScalarGridSpec(
            num_scalar_prefetch=0,
            grid=(n_blocks,),
            in_specs=[
                pl.BlockSpec((tn, C + 3), lambda i: (i, 0)),     # streamed ids
                pl.BlockSpec((4 * V, ow), lambda i: (0, 0)),     # resident weights
                pl.BlockSpec((1, ow), lambda i: (0, 0)),         # resident bias
            ],
            out_specs=pl.BlockSpec((tn, ow), lambda i: (i, 0)),  # lane-dense output
        ),
        compiler_params=pltpu.CompilerParams(
            dimension_semantics=("parallel",),
            # Headroom below v7x's 64 MiB physical VMEM; v5e/v6e have 128 MiB if
            # tile_n is ever pushed past ~8192.
            vmem_limit_bytes=48 * 1024 * 1024,
        ),
    )(ids, w_pad, b_pad)

    # char_out = char_cnn.view(B, S, -1); dropout = identity in eval mode.
    return out[:N, :two_h].reshape(B, S, two_h)


def reference_forward(x_ids, emb, w3, b3, w4, b4):
    """Pure-JAX reference mirroring the PyTorch module (NCW conv path)."""
    B, S, C = x_ids.shape
    N = B * S
    xe = jnp.take(emb, x_ids.reshape(N, C), axis=0)        # (N, C, E)
    xc = jnp.transpose(xe, (0, 2, 1))                      # (N, E, C)  = NCW

    def branch(w_keh, b):
        w = jnp.transpose(w_keh, (2, 1, 0))                # (H, E, k) = OIH
        y = jax.lax.conv_general_dilated(
            xc, w, window_strides=(1,), padding=[(1, 1)],
            dimension_numbers=("NCH", "OIH", "NCH"),
            precision=jax.lax.Precision.HIGHEST)
        y = jnp.tanh(y + b.reshape(1, -1, 1))
        return jnp.max(y, axis=2)                          # F.max_pool1d(full length)

    m3 = branch(w3, b3)
    m4 = branch(w4, b4)
    return jnp.concatenate([m3, m4], axis=1).reshape(B, S, -1)


if __name__ == "__main__":
    # Small shapes consistent with the module.
    B, S, C = 2, 4, 8          # batch, seq_len, char_len
    E, H, V = 16, 32, 20       # embedding_dim, hidden_dim, vocab_size

    key = jax.random.PRNGKey(0)
    k_ids, k_emb, k_w3, k_b3, k_w4, k_b4 = jax.random.split(key, 6)

    x_ids = jax.random.randint(k_ids, (B, S, C), 0, V, dtype=jnp.int32)

    # Deterministic synthetic parameters (shapes from __init__):
    #   embeddings : (V, E), uniform(-sqrt(3/E), sqrt(3/E))
    #   conv_k weights stored as (k, E, H)  (== torch (H, E, k) transposed)
    emb_scale = (3.0 / E) ** 0.5
    emb = jax.random.uniform(k_emb, (V, E), jnp.float32, -emb_scale, emb_scale)
    w_scale3 = (1.0 / (E * 3)) ** 0.5
    w_scale4 = (1.0 / (E * 4)) ** 0.5
    w3 = jax.random.uniform(k_w3, (3, E, H), jnp.float32, -w_scale3, w_scale3)
    b3 = jax.random.uniform(k_b3, (1, H), jnp.float32, -w_scale3, w_scale3)
    w4 = jax.random.uniform(k_w4, (4, E, H), jnp.float32, -w_scale4, w_scale4)
    b4 = jax.random.uniform(k_b4, (1, H), jnp.float32, -w_scale4, w_scale4)

    out = charcnn_forward(x_ids, emb, w3, b3, w4, b4)
    out = jax.block_until_ready(out)

    ref = reference_forward(x_ids, emb, w3, b3, w4, b4)
    ref = jax.block_until_ready(ref)

    assert out.shape == (B, S, 2 * H), out.shape
    max_err = float(jnp.max(jnp.abs(out - ref)))
    assert jnp.allclose(out, ref, atol=1e-4, rtol=1e-4), max_err

    print("KERNEL_OK")
</pallas_src>

<mosaic_0001>
module attributes {stable_mosaic.version = 11 : i64} {
  func.func @charcnn_kernel(%arg0: i32, %arg1: memref<8x11xi32, #tpu.memory_space<vmem>>, %arg2: memref<80x128xf32, #tpu.memory_space<vmem>>, %arg3: memref<1x128xf32, #tpu.memory_space<vmem>>, %arg4: memref<8x128xf32, #tpu.memory_space<vmem>>) attributes {dimension_semantics = [#tpu.dimension_semantics<parallel>], iteration_bounds = array<i64: 2>, scalar_prefetch = 0 : i64, scratch_operands = 0 : i64, tpu.core_type = #tpu.core_type<tc>, window_params = [{transform_indices = @transform_0, window_bounds = array<i64: 8, 11>}, {pipeline_mode = #tpu.pipeline_mode<synchronous>, transform_indices = @transform_1, window_bounds = array<i64: 80, 128>}, {pipeline_mode = #tpu.pipeline_mode<synchronous>, transform_indices = @transform_2, window_bounds = array<i64: 1, 128>}, {transform_indices = @transform_3, window_bounds = array<i64: 8, 128>}]} {
    %c0 = arith.constant 0 : index
    %c0_0 = arith.constant 0 : index
    %0 = vector.load %arg1[%c0, %c0_0] : memref<8x11xi32, #tpu.memory_space<vmem>>, vector<8x11xi32>
    %c0_1 = arith.constant 0 : index
    %c0_2 = arith.constant 0 : index
    %1 = vector.load %arg2[%c0_1, %c0_2] : memref<80x128xf32, #tpu.memory_space<vmem>>, vector<80x128xf32>
    %c0_3 = arith.constant 0 : index
    %c0_4 = arith.constant 0 : index
    %2 = vector.load %arg3[%c0_3, %c0_4] : memref<1x128xf32, #tpu.memory_space<vmem>>, vector<1x128xf32>
    %3 = vector.extract_strided_slice %0 {offsets = [0, 0], sizes = [8, 1], strides = [1, 1]} : vector<8x11xi32> to vector<8x1xi32>
    %4 = vector.shape_cast %3 : vector<8x1xi32> to vector<8x1xi32>
    %5 = vector.broadcast %4 : vector<8x1xi32> to vector<8x80xi32>
    %6 = vector.extract_strided_slice %0 {offsets = [0, 1], sizes = [8, 1], strides = [1, 1]} : vector<8x11xi32> to vector<8x1xi32>
    %7 = vector.shape_cast %6 : vector<8x1xi32> to vector<8x1xi32>
    %8 = vector.broadcast %7 : vector<8x1xi32> to vector<8x80xi32>
    %9 = vector.extract_strided_slice %0 {offsets = [0, 2], sizes = [8, 1], strides = [1, 1]} : vector<8x11xi32> to vector<8x1xi32>
    %10 = vector.shape_cast %9 : vector<8x1xi32> to vector<8x1xi32>
    %11 = vector.broadcast %10 : vector<8x1xi32> to vector<8x80xi32>
    %12 = vector.extract_strided_slice %0 {offsets = [0, 3], sizes = [8, 1], strides = [1, 1]} : vector<8x11xi32> to vector<8x1xi32>
    %13 = vector.shape_cast %12 : vector<8x1xi32> to vector<8x1xi32>
    %14 = vector.broadcast %13 : vector<8x1xi32> to vector<8x80xi32>
    %15 = vector.extract_strided_slice %0 {offsets = [0, 4], sizes = [8, 1], strides = [1, 1]} : vector<8x11xi32> to vector<8x1xi32>
    %16 = vector.shape_cast %15 : vector<8x1xi32> to vector<8x1xi32>
    %17 = vector.broadcast %16 : vector<8x1xi32> to vector<8x80xi32>
    %18 = vector.extract_strided_slice %0 {offsets = [0, 5], sizes = [8, 1], strides = [1, 1]} : vector<8x11xi32> to vector<8x1xi32>
    %19 = vector.shape_cast %18 : vector<8x1xi32> to vector<8x1xi32>
    %20 = vector.broadcast %19 : vector<8x1xi32> to vector<8x80xi32>
    %21 = vector.extract_strided_slice %0 {offsets = [0, 6], sizes = [8, 1], strides = [1, 1]} : vector<8x11xi32> to vector<8x1xi32>
    %22 = vector.shape_cast %21 : vector<8x1xi32> to vector<8x1xi32>
    %23 = vector.broadcast %22 : vector<8x1xi32> to vector<8x80xi32>
    %24 = vector.extract_strided_slice %0 {offsets = [0, 7], sizes = [8, 1], strides = [1, 1]} : vector<8x11xi32> to vector<8x1xi32>
    %25 = vector.shape_cast %24 : vector<8x1xi32> to vector<8x1xi32>
    %26 = vector.broadcast %25 : vector<8x1xi32> to vector<8x80xi32>
    %27 = vector.extract_strided_slice %0 {offsets = [0, 8], sizes = [8, 1], strides = [1, 1]} : vector<8x11xi32> to vector<8x1xi32>
    %28 = vector.shape_cast %27 : vector<8x1xi32> to vector<8x1xi32>
    %29 = vector.broadcast %28 : vector<8x1xi32> to vector<8x80xi32>
    %30 = vector.extract_strided_slice %0 {offsets = [0, 9], sizes = [8, 1], strides = [1, 1]} : vector<8x11xi32> to vector<8x1xi32>
    %31 = vector.shape_cast %30 : vector<8x1xi32> to vector<8x1xi32>
    %32 = vector.broadcast %31 : vector<8x1xi32> to vector<8x80xi32>
    %33 = vector.extract_strided_slice %0 {offsets = [0, 10], sizes = [8, 1], strides = [1, 1]} : vector<8x11xi32> to vector<8x1xi32>
    %34 = vector.shape_cast %33 : vector<8x1xi32> to vector<8x1xi32>
    %35 = vector.broadcast %34 : vector<8x1xi32> to vector<8x80xi32>
    %36 = tpu.iota {dimensions = array<i32: 1>} : vector<8x80xi32>
    %c0_i32 = arith.constant 0 : i32
    %37 = vector.broadcast %c0_i32 : i32 to vector<8x80xi32>
    %38 = arith.subi %36, %37 : vector<8x80xi32>
    %c20_i32 = arith.constant 20 : i32
    %39 = vector.broadcast %c20_i32 : i32 to vector<8x80xi32>
    %40 = arith.subi %36, %39 : vector<8x80xi32>
    %c40_i32 = arith.constant 40 : i32
    %41 = vector.broadcast %c40_i32 : i32 to vector<8x80xi32>
    %42 = arith.subi %36, %41 : vector<8x80xi32>
    %c60_i32 = arith.constant 60 : i32
    %43 = vector.broadcast %c60_i32 : i32 to vector<8x80xi32>
    %44 = arith.subi %36, %43 : vector<8x80xi32>
    %45 = tpu.iota {dimensions = array<i32: 1>} : vector<8x128xi32>
    %cst = arith.constant -3.000000e+38 : f32
    %46 = vector.broadcast %cst : f32 to vector<8x128xf32>
    %47 = arith.cmpi eq, %38, %5 : vector<8x80xi32>
    %48 = arith.cmpi eq, %40, %8 : vector<8x80xi32>
    %49 = arith.ori %47, %48 : vector<8x80xi1>
    %50 = arith.cmpi eq, %42, %11 : vector<8x80xi32>
    %51 = arith.ori %49, %50 : vector<8x80xi1>
    %52 = arith.cmpi eq, %44, %14 : vector<8x80xi32>
    %53 = arith.ori %51, %52 : vector<8x80xi1>
    %54 = arith.extui %53 : vector<8x80xi1> to vector<8x80xi32>
    %55 = arith.sitofp %54 : vector<8x80xi32> to vector<8x80xf32>
    %cst_5 = arith.constant dense<0.000000e+00> : vector<8x128xf32>
    %56 = tpu.matmul %55, %1, %cst_5 {dimension_numbers = #tpu.dot_dimension_numbers<[1], [0], [0], [1], [0, 0, 1, 1], [], []>} : vector<8x80xf32>, vector<80x128xf32>, vector<8x128xf32> -> vector<8x128xf32>
    %57 = arith.maximumf %46, %56 : vector<8x128xf32>
    %58 = arith.cmpi eq, %38, %8 : vector<8x80xi32>
    %59 = arith.cmpi eq, %40, %11 : vector<8x80xi32>
    %60 = arith.ori %58, %59 : vector<8x80xi1>
    %61 = arith.cmpi eq, %42, %14 : vector<8x80xi32>
    %62 = arith.ori %60, %61 : vector<8x80xi1>
    %63 = arith.cmpi eq, %44, %17 : vector<8x80xi32>
    %64 = arith.ori %62, %63 : vector<8x80xi1>
    %65 = arith.extui %64 : vector<8x80xi1> to vector<8x80xi32>
    %66 = arith.sitofp %65 : vector<8x80xi32> to vector<8x80xf32>
    %cst_6 = arith.constant dense<0.000000e+00> : vector<8x128xf32>
    %67 = tpu.matmul %66, %1, %cst_6 {dimension_numbers = #tpu.dot_dimension_numbers<[1], [0], [0], [1], [0, 0, 1, 1], [], []>} : vector<8x80xf32>, vector<80x128xf32>, vector<8x128xf32> -> vector<8x128xf32>
    %68 = arith.maximumf %57, %67 : vector<8x128xf32>
    %69 = arith.cmpi eq, %38, %11 : vector<8x80xi32>
    %70 = arith.cmpi eq, %40, %14 : vector<8x80xi32>
    %71 = arith.ori %69, %70 : vector<8x80xi1>
    %72 = arith.cmpi eq, %42, %17 : vector<8x80xi32>
    %73 = arith.ori %71, %72 : vector<8x80xi1>
    %74 = arith.cmpi eq, %44, %20 : vector<8x80xi32>
    %75 = arith.ori %73, %74 : vector<8x80xi1>
    %76 = arith.extui %75 : vector<8x80xi1> to vector<8x80xi32>
    %77 = arith.sitofp %76 : vector<8x80xi32> to vector<8x80xf32>
    %cst_7 = arith.constant dense<0.000000e+00> : vector<8x128xf32>
    %78 = tpu.matmul %77, %1, %cst_7 {dimension_numbers = #tpu.dot_dimension_numbers<[1], [0], [0], [1], [0, 0, 1, 1], [], []>} : vector<8x80xf32>, vector<80x128xf32>, vector<8x128xf32> -> vector<8x128xf32>
    %79 = arith.maximumf %68, %78 : vector<8x128xf32>
    %80 = arith.cmpi eq, %38, %14 : vector<8x80xi32>
    %81 = arith.cmpi eq, %40, %17 : vector<8x80xi32>
    %82 = arith.ori %80, %81 : vector<8x80xi1>
    %83 = arith.cmpi eq, %42, %20 : vector<8x80xi32>
    %84 = arith.ori %82, %83 : vector<8x80xi1>
    %85 = arith.cmpi eq, %44, %23 : vector<8x80xi32>
    %86 = arith.ori %84, %85 : vector<8x80xi1>
    %87 = arith.extui %86 : vector<8x80xi1> to vector<8x80xi32>
    %88 = arith.sitofp %87 : vector<8x80xi32> to vector<8x80xf32>
    %cst_8 = arith.constant dense<0.000000e+00> : vector<8x128xf32>
    %89 = tpu.matmul %88, %1, %cst_8 {dimension_numbers = #tpu.dot_dimension_numbers<[1], [0], [0], [1], [0, 0, 1, 1], [], []>} : vector<8x80xf32>, vector<80x128xf32>, vector<8x128xf32> -> vector<8x128xf32>
    %90 = arith.maximumf %79, %89 : vector<8x128xf32>
    %91 = arith.cmpi eq, %38, %17 : vector<8x80xi32>
    %92 = arith.cmpi eq, %40, %20 : vector<8x80xi32>
    %93 = arith.ori %91, %92 : vector<8x80xi1>
    %94 = arith.cmpi eq, %42, %23 : vector<8x80xi32>
    %95 = arith.ori %93, %94 : vector<8x80xi1>
    %96 = arith.cmpi eq, %44, %26 : vector<8x80xi32>
    %97 = arith.ori %95, %96 : vector<8x80xi1>
    %98 = arith.extui %97 : vector<8x80xi1> to vector<8x80xi32>
    %99 = arith.sitofp %98 : vector<8x80xi32> to vector<8x80xf32>
    %cst_9 = arith.constant dense<0.000000e+00> : vector<8x128xf32>
    %100 = tpu.matmul %99, %1, %cst_9 {dimension_numbers = #tpu.dot_dimension_numbers<[1], [0], [0], [1], [0, 0, 1, 1], [], []>} : vector<8x80xf32>, vector<80x128xf32>, vector<8x128xf32> -> vector<8x128xf32>
    %101 = arith.maximumf %90, %100 : vector<8x128xf32>
    %102 = arith.cmpi eq, %38, %20 : vector<8x80xi32>
    %103 = arith.cmpi eq, %40, %23 : vector<8x80xi32>
    %104 = arith.ori %102, %103 : vector<8x80xi1>
    %105 = arith.cmpi eq, %42, %26 : vector<8x80xi32>
    %106 = arith.ori %104, %105 : vector<8x80xi1>
    %107 = arith.cmpi eq, %44, %29 : vector<8x80xi32>
    %108 = arith.ori %106, %107 : vector<8x80xi1>
    %109 = arith.extui %108 : vector<8x80xi1> to vector<8x80xi32>
    %110 = arith.sitofp %109 : vector<8x80xi32> to vector<8x80xf32>
    %cst_10 = arith.constant dense<0.000000e+00> : vector<8x128xf32>
    %111 = tpu.matmul %110, %1, %cst_10 {dimension_numbers = #tpu.dot_dimension_numbers<[1], [0], [0], [1], [0, 0, 1, 1], [], []>} : vector<8x80xf32>, vector<80x128xf32>, vector<8x128xf32> -> vector<8x128xf32>
    %112 = arith.maximumf %101, %111 : vector<8x128xf32>
    %113 = arith.cmpi eq, %38, %23 : vector<8x80xi32>
    %114 = arith.cmpi eq, %40, %26 : vector<8x80xi32>
    %115 = arith.ori %113, %114 : vector<8x80xi1>
    %116 = arith.cmpi eq, %42, %29 : vector<8x80xi32>
    %117 = arith.ori %115, %116 : vector<8x80xi1>
    %118 = arith.cmpi eq, %44, %32 : vector<8x80xi32>
    %119 = arith.ori %117, %118 : vector<8x80xi1>
    %120 = arith.extui %119 : vector<8x80xi1> to vector<8x80xi32>
    %121 = arith.sitofp %120 : vector<8x80xi32> to vector<8x80xf32>
    %cst_11 = arith.constant dense<0.000000e+00> : vector<8x128xf32>
    %122 = tpu.matmul %121, %1, %cst_11 {dimension_numbers = #tpu.dot_dimension_numbers<[1], [0], [0], [1], [0, 0, 1, 1], [], []>} : vector<8x80xf32>, vector<80x128xf32>, vector<8x128xf32> -> vector<8x128xf32>
    %123 = arith.maximumf %112, %122 : vector<8x128xf32>
    %124 = arith.cmpi eq, %38, %26 : vector<8x80xi32>
    %125 = arith.cmpi eq, %40, %29 : vector<8x80xi32>
    %126 = arith.ori %124, %125 : vector<8x80xi1>
    %127 = arith.cmpi eq, %42, %32 : vector<8x80xi32>
    %128 = arith.ori %126, %127 : vector<8x80xi1>
    %129 = arith.cmpi eq, %44, %35 : vector<8x80xi32>
    %130 = arith.ori %128, %129 : vector<8x80xi1>
    %131 = arith.extui %130 : vector<8x80xi1> to vector<8x80xi32>
    %132 = arith.sitofp %131 : vector<8x80xi32> to vector<8x80xf32>
    %cst_12 = arith.constant dense<0.000000e+00> : vector<8x128xf32>
    %133 = tpu.matmul %132, %1, %cst_12 {dimension_numbers = #tpu.dot_dimension_numbers<[1], [0], [0], [1], [0, 0, 1, 1], [], []>} : vector<8x80xf32>, vector<80x128xf32>, vector<8x128xf32> -> vector<8x128xf32>
    %c32_i32 = arith.constant 32 : i32
    %134 = vector.broadcast %c32_i32 : i32 to vector<8x128xi32>
    %135 = arith.cmpi slt, %45, %134 : vector<8x128xi32>
    %136 = arith.maximumf %123, %133 : vector<8x128xf32>
    %137 = arith.select %135, %136, %123 : vector<8x128xi1>, vector<8x128xf32>
    %138 = vector.broadcast %2 : vector<1x128xf32> to vector<8x128xf32>
    %139 = arith.addf %137, %138 : vector<8x128xf32>
    %140 = math.tanh %139 : vector<8x128xf32>
    %c0_13 = arith.constant 0 : index
    %c0_14 = arith.constant 0 : index
    %141 = vector.load %arg4[%c0_13, %c0_14] : memref<8x128xf32, #tpu.memory_space<vmem>>, vector<8x128xf32>
    tpu.vector_store %arg4[%c0_13, %c0_14], %140 {strides = array<i32>} : memref<8x128xf32, #tpu.memory_space<vmem>>, vector<8x128xf32>,
    return
  }
  func.func @transform_0(%arg0: i32) -> (i32, i32) {
    %c0_i32 = arith.constant 0 : i32
    %c0_i32_0 = arith.constant 0 : i32
    return %arg0, %c0_i32 : i32, i32
  }
  func.func @transform_1(%arg0: i32) -> (i32, i32) {
    %c0_i32 = arith.constant 0 : i32
    %c0_i32_0 = arith.constant 0 : i32
    %c0_i32_1 = arith.constant 0 : i32
    return %c0_i32, %c0_i32_0 : i32, i32
  }
  func.func @transform_2(%arg0: i32) -> (i32, i32) {
    %c0_i32 = arith.constant 0 : i32
    %c0_i32_0 = arith.constant 0 : i32
    %c0_i32_1 = arith.constant 0 : i32
    return %c0_i32, %c0_i32_0 : i32, i32
  }
  func.func @transform_3(%arg0: i32) -> (i32, i32) {
    %c0_i32 = arith.constant 0 : i32
    %c0_i32_0 = arith.constant 0 : i32
    return %arg0, %c0_i32 : i32, i32
  }
}

</mosaic_0001>

<bundles_post_ra>
// kernel: charcnn_forward.1
= control target key start
LH: loop header
LB: loop body
LE: loop exit
PB: predicated region body
PF: predicated region fallthrough
CT: control target
= control target key end

     0   :  { %s1322_s12 = smov 0   ;;  %s1715_s0 = inlined_call_operand.vmem [shape: s32[16,11], index: 0, kind: input, shape index: {}]   ;;  %s1716_s1 = inlined_call_operand.vmem [shape: f32[80,128], index: 1, kind: input, shape index: {}]   ;;  %s1717_s2 = inlined_call_operand.vmem [shape: f32[1,128], index: 2, kind: input, shape index: {}]   ;;  %s1718_s3 = inlined_call_operand.vmem [shape: f32[16,128], index: 3, kind: output, shape index: {}]  }
   0x1 LB: > { %s945_s13 = sadd.s32 4294967295, %s1287_s12   ;;  %p949_p0 = scmp.ge.s32.totalorder %s1287_s12, 1  ;;  %s1287_s12 = sphi %s1322_s12, %s13_s12  }
   0x2   : > { %p136_p1 = scmp.lt.s32.totalorder %s1287_s12, 3 }
   0x4   : > { %p137_p2 = pnand %p949_p0, %p136_p1 }
   0x5   : > { %p158_p3 = scmp.lt.s32.totalorder (!%p137_p2), %s945_s13, 1 }
   0x6   : > { %140 = sbr.rel (%p137_p2) target bundleno = 433 (0x1b1), region = 32 }
   0xb   : > { %v1289_v0 = vmov 2   ;;  %v1290_v1 = vmov 0   ;;  %v1333_v2 = vld [vmem:[%s1716_s1 + $0x48] sm:$0xff]  ;;  %s1728_s13 = smov (!%p158_p3, %s945_s13), 1  ;;  %v1291_v3 = vmov 0.0   ;;  %v1341_v4 = vld [vmem:[%s1716_s1 + $0x40] sm:$0xff]  ;;  %v211_v23 = vlaneseq }
   0xc   : > { %1269 = vset.pattern.permute.xlu1 %v1289_v0  ;;  %1267 = vset.pattern.permute.xlu0 %v1290_v1  ;;  %s950_s18 = sshll.u32 %s1728_s13, 3  ;;  %v1360_v6 = vld [vmem:[%s1716_s1 + $0x38] sm:$0xff]  ;;  %v1373_v7 = vld [vmem:[%s1716_s1 + $0x30] sm:$0xff]  ;;  %v1292_v8 = vmov 3   ;;  %v1293_v9 = vmov 1   ;;  %v1381_v10 = vld [vmem:[%s1716_s1 + $0x28] sm:$0xff] }
   0xd   : > { %1062 = vmatprep.subr.mxu0 %v1291_v3  ;;  %1085 = vmatprep.subr.mxu1 %v1291_v3  ;;  %s161_s21 = scalar_lea.vmem %s1715_s0, %s950_s18  ;;  %v1294_v11 = vmov 4   ;;  %v1295_v12 = vmov 5   ;;  %v1392_v13 = vld [vmem:[%s1716_s1 + $0x20] sm:$0xff]  ;;  %v1404_v14 = vld [vmem:[%s1716_s1 + $0x18] sm:$0xff]  ;;  %v1296_v15 = vmov 6   ;;  %v1297_v16 = vmov 8   ;;  %s165_s17 = scalar_lea.vmem %s1718_s3, %s950_s18 }
   0xe   : > { %1063 = vmatpush3.msra.mxu0 %v1333_v2  ;;  %1086 = vmatpush3.msra.mxu1 %v1333_v2  ;;  %v1354_v5 = vld [vmem:[%s161_s21] sm:$0xff]  ;;  %v1412_v17 = vld [vmem:[%s1716_s1 + $0x10] sm:$0xff]  ;;  %v1420_v18 = vld [vmem:[%s1716_s1 + $0x8] sm:$0xff]  ;;  %v1298_v19 = vmov 7   ;;  %vm1299_vm0 = vmmov 0   ;;  %v1300_v21 = vmov 9  }
   0xf   : > { %1064 = vmatprep.subr.mxu0 %v1291_v3  ;;  %1087 = vmatprep.subr.mxu1 %v1291_v3  ;;  %v1429_v20 = vld [vmem:[%s1716_s1] sm:$0xff]  ;;  %v1301_v22 = vmov 10   ;;  %v1449_v26 = vand.u32 127, %v211_v23  ;;  %vm225_vm13 = vcmask 654336  }
  0x10   : > { %1065 = vmatpush3.msra.mxu0 %v1341_v4  ;;  %1088 = vmatpush3.msra.mxu1 %v1341_v4 }
  0x11   : > { %185 = vperm.xlu1 %1269, %v1354_v5   ;;  %179 = vperm.xlu0 %1267, %v1354_v5   ;;  %v1452_v27 = vadd.s32 4294967276, %v1449_v26  ;;  %v1458_v30 = vadd.s32 4294967256, %v1449_v26  ;;  %v1467_v32 = vadd.s32 4294967236, %v1449_v26 }
  0x12   : > { %1066 = vmatprep.subr.mxu0 %v1291_v3  ;;  %1089 = vmatprep.subr.mxu1 %v1291_v3 }
  0x13   : > { %1067 = vmatpush3.msra.mxu0 %v1360_v6  ;;  %1090 = vmatpush3.msra.mxu1 %v1360_v6 }
  0x14   : > { %1068 = vmatprep.subr.mxu0 %v1291_v3  ;;  %1091 = vmatprep.subr.mxu1 %v1291_v3 }
  0x15   : > { %1270 = vset.pattern.permute.xlu1 %v1292_v8  ;;  %1268 = vset.pattern.permute.xlu0 %v1293_v9  ;;  %v971_v9 = vld [vmem:[%s1717_s2] ss:$0 sm:$0xff] }
  0x16   : > { %188 = vperm.xlu1 %1270, %v1354_v5   ;;  %182 = vperm.xlu0 %1268, %v1354_v5  }
  0x17   : > { %1069 = vmatpush3.msra.mxu0 %v1373_v7  ;;  %1092 = vmatpush3.msra.mxu1 %v1373_v7 }
  0x18   : > { %1070 = vmatprep.subr.mxu0 %v1291_v3  ;;  %1093 = vmatprep.subr.mxu1 %v1291_v3 }
  0x19   : > { %1071 = vmatpush3.msra.mxu0 %v1381_v10  ;;  %1094 = vmatpush3.msra.mxu1 %v1381_v10 }
  0x1a   : > { %1271 = vset.pattern.permute.xlu1 %v1294_v11  ;;  %1272 = vset.pattern.permute.xlu0 %v1295_v12 }
  0x1b   : > { %191 = vperm.xlu1 %1271, %v1354_v5   ;;  %194 = vperm.xlu0 %1272, %v1354_v5  }
  0x1c   : > { %1072 = vmatprep.subr.mxu0 %v1291_v3  ;;  %1095 = vmatprep.subr.mxu1 %v1291_v3 }
  0x1d   : > { %1073 = vmatpush3.msra.mxu0 %v1392_v13  ;;  %1096 = vmatpush3.msra.mxu1 %v1392_v13 }
  0x1e   : > { %1074 = vmatprep.subr.mxu0 %v1291_v3  ;;  %1097 = vmatprep.subr.mxu1 %v1291_v3 }
  0x1f   : > { %1273 = vset.pattern.permute.xlu1 %v1296_v15  ;;  %1275 = vset.pattern.permute.xlu0 %v1297_v16 }
  0x20   : > { %197 = vperm.xlu1 %1273, %v1354_v5   ;;  %203 = vperm.xlu0 %1275, %v1354_v5  }
  0x21   : > { %1075 = vmatpush3.msra.mxu0 %v1404_v14  ;;  %1098 = vmatpush3.msra.mxu1 %v1404_v14 }
  0x22   : > { %1076 = vmatprep.subr.mxu0 %v1291_v3  ;;  %1099 = vmatprep.subr.mxu1 %v1291_v3 }
  0x23   : > { %1077 = vmatpush3.msra.mxu0 %v1412_v17  ;;  %1100 = vmatpush3.msra.mxu1 %v1412_v17 }
  0x24   : > { %1274 = vset.pattern.permute.xlu1 %v1298_v19  ;;  %1078 = vmatprep.subr.mxu0 %v1291_v3 }
  0x25   : > { %200 = vperm.xlu1 %1274, %v1354_v5   ;;  %1079 = vmatpush3.msra.mxu0 %v1420_v18 }
  0x26   : > { %1080 = vmatprep.subr.mxu0 %v1291_v3  ;;  %1101 = vmatprep.subr.mxu1 %v1291_v3 }
  0x27   : > { %1081 = vmatpush3.msra.mxu0 %v1429_v20  ;;  %1082 = vmatprep.mubr.msk.f32.mxu0 %vm1299_vm0, %v1291_v3 }
  0x28   : > { %1102 = vmatpush3.msra.mxu1 %v1420_v18  ;;  %1108 = vmatprep.subr.mxu0 %v1291_v3 }
  0x29   : > { %1276 = vset.pattern.permute.xlu1 %v1300_v21  ;;  %1103 = vmatprep.subr.mxu1 %v1291_v3 }
  0x2a   : > { %206 = vperm.xlu1 %1276, %v1354_v5   ;;  %1104 = vmatpush3.msra.mxu1 %v1429_v20 }
  0x2b   : > { %1105 = vmatprep.mubr.msk.f32.mxu1 %vm1299_vm0, %v1291_v3  ;;  %1131 = vmatprep.subr.mxu1 %v1291_v3 }
  0x2c   : > { %1278 = vset.pattern.permute.xlu0 %v1301_v22 }
  0x2e   : > { %1277 = vset.pattern.permute.xlu1 %v1301_v22 }
  0x2f   : > { %209 = vperm.xlu1 %1277, %v1354_v5  }
  0x8c   : > { %v1447_v24 = vpop.permute.xlu1 %185  ;;  %v180_v25 = vpop.permute.xlu0 %179 }
  0x8d   : > { %vm216_vm2 = vcmp.eq.s32.totalorder %v1449_v26, %v180_v25  ;;  %vm301_vm5 = vcmp.eq.s32.totalorder %v1452_v27, %v1447_v24  ;;  %vm219_vm6 = vcmp.eq.s32.totalorder %v1458_v30, %v1447_v24 }
  0x91   : > { %v1454_v28 = vpop.permute.xlu1 %188  ;;  %v183_v29 = vpop.permute.xlu0 %182 }
  0x92   : > { %vm217_vm1 = vcmp.eq.s32.totalorder %v1452_v27, %v183_v29  ;;  %vm300_vm3 = vcmp.eq.s32.totalorder %v1449_v26, %v183_v29  ;;  %vm303_vm7 = vcmp.eq.s32.totalorder %v1458_v30, %v1454_v28  ;;  %vm221_vm12 = vcmp.eq.s32.totalorder %v1467_v32, %v1454_v28 }
  0x93   : > { %vm218_vm4 = vmor %vm216_vm2, %vm217_vm1 }
  0x94   : > { %vm302_vm8 = vmor %vm300_vm3, %vm301_vm5 }
  0x95   : > { %vm220_vm9 = vmor %vm218_vm4, %vm219_vm6 }
  0x96   : > { %v1462_v31 = vpop.permute.xlu1 %191  ;;  %vm304_vm11 = vmor %vm302_vm8, %vm303_vm7  ;;  %v1475_v33 = vpop.permute.xlu0 %194 }
  0x97   : > { %vm305_vm10 = vcmp.eq.s32.totalorder %v1467_v32, %v1462_v31  ;;  %vm222_vm14 = vmor %vm220_vm9, %vm221_vm12 }
  0x98   : > { %v955_v35 = vsel %vm222_vm14, 1.0, %v1291_v3  ;;  %vm306_vm15 = vmor %vm304_vm11, %vm305_vm10  ;;  %vm384_vm11 = vcmp.eq.s32.totalorder %v1452_v27, %v1454_v28  ;;  %vm386_vm14 = vcmp.eq.s32.totalorder %v1458_v30, %v1462_v31 }
  0x99   : > { %1083 = vmatmul.mubr.msk.f32.vlgmr.msra.gmra.mxu0 %vm225_vm13, %v955_v35  ;;  %v957_v36 = vsel %vm306_vm15, 1.0, %v1291_v3 }
  0x9a   : > { %1109 = vmatpush3.msra.mxu0 %v1333_v2  ;;  %1106 = vmatmul.mubr.msk.f32.vlgmr.msra.gmra.mxu1 %vm225_vm13, %v957_v36 }
  0x9b   : > { %v1479_v34 = vpop.permute.xlu1 %197  ;;  %v1486_v37 = vpop.permute.xlu0 %203  ;;  %1110 = vmatprep.subr.mxu0 %v1291_v3  ;;  %1132 = vmatpush3.msra.mxu1 %v1333_v2 }
  0x9c   : > { %vm715_vm1 = vcmp.eq.s32.totalorder %v1449_v26, %v1479_v34  ;;  %1111 = vmatpush3.msra.mxu0 %v1341_v4  ;;  %1133 = vmatprep.subr.mxu1 %v1291_v3  ;;  %vm718_vm3 = vcmp.eq.s32.totalorder %v1458_v30, %v1486_v37  ;;  %vm799_vm6 = vcmp.eq.s32.totalorder %v1452_v27, %v1486_v37 }
  0x9d   : > { %1112 = vmatprep.subr.mxu0 %v1291_v3  ;;  %1134 = vmatpush3.msra.mxu1 %v1341_v4 }
  0x9e   : > { %1113 = vmatpush3.msra.mxu0 %v1360_v6  ;;  %1135 = vmatprep.subr.mxu1 %v1291_v3 }
  0x9f   : > { %1114 = vmatprep.subr.mxu0 %v1291_v3  ;;  %1136 = vmatpush3.msra.mxu1 %v1360_v6 }
  0xa0   : > { %v1490_v38 = vpop.permute.xlu1 %200  ;;  %1115 = vmatpush3.msra.mxu0 %v1373_v7  ;;  %1137 = vmatprep.subr.mxu1 %v1291_v3 }
  0xa1   : > { %vm716_vm2 = vcmp.eq.s32.totalorder %v1452_v27, %v1490_v38  ;;  %vm798_vm5 = vcmp.eq.s32.totalorder %v1449_v26, %v1490_v38  ;;  %1116 = vmatprep.subr.mxu0 %v1291_v3  ;;  %1138 = vmatpush3.msra.mxu1 %v1373_v7 }
  0xa2   : > { %vm717_vm4 = vmor %vm715_vm1, %vm716_vm2  ;;  %1117 = vmatpush3.msra.mxu0 %v1381_v10  ;;  %1139 = vmatprep.subr.mxu1 %v1291_v3  ;;  %vm383_vm1 = vcmp.eq.s32.totalorder %v1449_v26, %v1447_v24 }
  0xa3   : > { %vm719_vm7 = vmor %vm717_vm4, %vm718_vm3  ;;  %1118 = vmatprep.subr.mxu0 %v1291_v3  ;;  %1140 = vmatpush3.msra.mxu1 %v1381_v10  ;;  %vm467_vm3 = vcmp.eq.s32.totalorder %v1452_v27, %v1462_v31 }
  0xa4   : > { %vm800_vm8 = vmor %vm798_vm5, %vm799_vm6  ;;  %1119 = vmatpush3.msra.mxu0 %v1392_v13  ;;  %1141 = vmatprep.subr.mxu1 %v1291_v3  ;;  %vm388_vm5 = vcmp.eq.s32.totalorder %v1467_v32, %v1475_v33 }
  0xa5   : > { %v207_v39 = vpop.permute.xlu1 %206  ;;  %vm385_vm2 = vmor %vm383_vm1, %vm384_vm11  ;;  %1120 = vmatprep.subr.mxu0 %v1291_v3  ;;  %1142 = vmatpush3.msra.mxu1 %v1392_v13  ;;  %vm471_vm11 = vcmp.eq.s32.totalorder %v1467_v32, %v1479_v34 }
  0xa6   : > { %vm720_vm9 = vcmp.eq.s32.totalorder %v1467_v32, %v207_v39  ;;  %vm801_vm10 = vcmp.eq.s32.totalorder %v1458_v30, %v207_v39  ;;  %vm1540_vm4 = vmor %vm385_vm2, %vm386_vm14  ;;  %1121 = vmatpush3.msra.mxu0 %v1404_v14  ;;  %1143 = vmatprep.subr.mxu1 %v1291_v3  ;;  %vm549_vm2 = vcmp.eq.s32.totalorder %v1449_v26, %v1462_v31 }
  0xa7   : > { %vm1520_vm12 = vmor %vm719_vm7, %vm720_vm9  ;;  %vm466_vm7 = vcmp.eq.s32.totalorder %v1449_v26, %v1454_v28  ;;  %1122 = vmatprep.subr.mxu0 %v1291_v3  ;;  %1144 = vmatpush3.msra.mxu1 %v1404_v14 }
  0xa8   : > { %vm1528_vm15 = vmor %vm800_vm8, %vm801_vm10  ;;  %vm469_vm10 = vcmp.eq.s32.totalorder %v1458_v30, %v1475_v33  ;;  %1123 = vmatpush3.msra.mxu0 %v1412_v17  ;;  %1145 = vmatprep.subr.mxu1 %v1291_v3  ;;  %v967_v49 = vsel %vm1520_vm12, 1.0, %v1291_v3 }
  0xa9   : > { %vm468_vm9 = vmor %vm466_vm7, %vm467_vm3  ;;  %1124 = vmatprep.subr.mxu0 %v1291_v3  ;;  %1146 = vmatpush3.msra.mxu1 %v1412_v17  ;;  %vm550_vm3 = vcmp.eq.s32.totalorder %v1452_v27, %v1475_v33 }
  0xaa   : > { %v210_v42 = vpop.permute.xlu1 %209  ;;  %vm389_vm14 = vmor %vm1540_vm4, %vm388_vm5  ;;  %1125 = vmatpush3.msra.mxu0 %v1420_v18  ;;  %1128 = vmatprep.mubr.msk.f32.mxu0 %vm1299_vm0, %v1291_v3  ;;  %vm632_vm4 = vcmp.eq.s32.totalorder %v1449_v26, %v1475_v33  ;;  %vm633_vm5 = vcmp.eq.s32.totalorder %v1452_v27, %v1479_v34 }
  0xab   : > { %vm803_vm6 = vcmp.eq.s32.totalorder %v1467_v32, %v210_v42  ;;  %1126 = vmatprep.subr.mxu0 %v1291_v3  ;;  %1147 = vmatprep.subr.mxu1 %v1291_v3  ;;  %v959_v45 = vsel %vm389_vm14, 1.0, %v1291_v3  ;;  %vm551_vm7 = vmor %vm549_vm2, %vm550_vm3  ;;  %vm637_vm2 = vcmp.eq.s32.totalorder %v1467_v32, %v1486_v37 }
  0xac   : > { %vm1555_vm8 = vmor %vm1528_vm15, %vm803_vm6  ;;  %1127 = vmatpush3.msra.mxu0 %v1429_v20  ;;  %1148 = vmatpush3.msra.mxu1 %v1420_v18  ;;  %vm552_vm6 = vcmp.eq.s32.totalorder %v1458_v30, %v1479_v34 }
  0xad   : > { %vm470_vm15 = vmor %vm468_vm9, %vm469_vm10  ;;  %1129 = vmatmul.mubr.msk.f32.vlgmr.msra.gmra.mxu0 %vm225_vm13, %v959_v45  ;;  %1154 = vmatprep.subr.mxu0 %v1291_v3  ;;  %vm554_vm9 = vcmp.eq.s32.totalorder %v1467_v32, %v1490_v38  ;;  %v969_v50 = vsel %vm1555_vm8, 1.0, %v1291_v3 }
  0xae   : > { %vm472_vm1 = vmor %vm470_vm15, %vm471_vm11  ;;  %1149 = vmatprep.subr.mxu1 %v1291_v3  ;;  %1155 = vmatpush3.msra.mxu0 %v1333_v2  ;;  %vm635_vm11 = vcmp.eq.s32.totalorder %v1458_v30, %v1490_v38 }
  0xaf   : > { %1150 = vmatpush3.msra.mxu1 %v1429_v20  ;;  %1151 = vmatprep.mubr.msk.f32.mxu1 %vm1299_vm0, %v1291_v3  ;;  %v961_v46 = vsel %vm472_vm1, 1.0, %v1291_v3  ;;  %vm634_vm10 = vmor %vm632_vm4, %vm633_vm5 }
  0xb0   : > { %1156 = vmatprep.subr.mxu0 %v1291_v3  ;;  %1152 = vmatmul.mubr.msk.f32.vlgmr.msra.gmra.mxu1 %vm225_vm13, %v961_v46  ;;  %vm553_vm14 = vmor %vm551_vm7, %vm552_vm6 }
  0xb1   : > { %1157 = vmatpush3.msra.mxu0 %v1341_v4  ;;  %1177 = vmatprep.subr.mxu1 %v1291_v3  ;;  %vm555_vm15 = vmor %vm553_vm14, %vm554_vm9 }
  0xb2   : > { %1158 = vmatprep.subr.mxu0 %v1291_v3  ;;  %1178 = vmatpush3.msra.mxu1 %v1333_v2  ;;  %vm636_vm1 = vmor %vm634_vm10, %vm635_vm11  ;;  %v963_v47 = vsel %vm555_vm15, 1.0, %v1291_v3 }
  0xb3   : > { %1159 = vmatpush3.msra.mxu0 %v1360_v6  ;;  %1179 = vmatprep.subr.mxu1 %v1291_v3  ;;  %vm638_vm3 = vmor %vm636_vm1, %vm637_vm2 }
  0xb4   : > { %1160 = vmatprep.subr.mxu0 %v1291_v3  ;;  %1180 = vmatpush3.msra.mxu1 %v1341_v4  ;;  %v965_v48 = vsel %vm638_vm3, 1.0, %v1291_v3 }
  0xb5   : > { %1161 = vmatpush3.msra.mxu0 %v1373_v7  ;;  %1181 = vmatprep.subr.mxu1 %v1291_v3 }
  0xb6   : > { %1162 = vmatprep.subr.mxu0 %v1291_v3  ;;  %1182 = vmatpush3.msra.mxu1 %v1360_v6 }
  0xb7   : > { %1163 = vmatpush3.msra.mxu0 %v1381_v10  ;;  %1183 = vmatprep.subr.mxu1 %v1291_v3 }
  0xb8   : > { %1164 = vmatprep.subr.mxu0 %v1291_v3  ;;  %1184 = vmatpush3.msra.mxu1 %v1373_v7 }
  0xb9   : > { %1165 = vmatpush3.msra.mxu0 %v1392_v13  ;;  %1185 = vmatprep.subr.mxu1 %v1291_v3 }
  0xba   : > { %1166 = vmatprep.subr.mxu0 %v1291_v3  ;;  %1186 = vmatpush3.msra.mxu1 %v1381_v10 }
  0xbb   : > { %1167 = vmatpush3.msra.mxu0 %v1404_v14  ;;  %1187 = vmatprep.subr.mxu1 %v1291_v3 }
  0xbc   : > { %1168 = vmatprep.subr.mxu0 %v1291_v3  ;;  %1188 = vmatpush3.msra.mxu1 %v1392_v13 }
  0xbd   : > { %1169 = vmatpush3.msra.mxu0 %v1412_v17  ;;  %1189 = vmatprep.subr.mxu1 %v1291_v3 }
  0xbe   : > { %1170 = vmatprep.subr.mxu0 %v1291_v3  ;;  %1190 = vmatpush3.msra.mxu1 %v1404_v14 }
  0xbf   : > { %1171 = vmatpush3.msra.mxu0 %v1420_v18  ;;  %1191 = vmatprep.subr.mxu1 %v1291_v3 }
  0xc0   : > { %1172 = vmatprep.subr.mxu0 %v1291_v3  ;;  %1192 = vmatpush3.msra.mxu1 %v1412_v17 }
  0xc1   : > { %1173 = vmatpush3.msra.mxu0 %v1429_v20  ;;  %1174 = vmatprep.mubr.msk.f32.mxu0 %vm1299_vm0, %v1291_v3 }
  0xc2   : > { %1193 = vmatprep.subr.mxu1 %v1291_v3  ;;  %1175 = vmatmul.mubr.msk.f32.vlgmr.msra.gmra.mxu0 %vm225_vm13, %v963_v47 }
  0xc3   : > { %1194 = vmatpush3.msra.mxu1 %v1420_v18  ;;  %1200 = vmatprep.subr.mxu0 %v1291_v3 }
  0xc4   : > { %1195 = vmatprep.subr.mxu1 %v1291_v3  ;;  %1201 = vmatpush3.msra.mxu0 %v1333_v2 }
  0xc5   : > { %1196 = vmatpush3.msra.mxu1 %v1429_v20  ;;  %1197 = vmatprep.mubr.msk.f32.mxu1 %vm1299_vm0, %v1291_v3 }
  0xc6   : > { %1202 = vmatprep.subr.mxu0 %v1291_v3  ;;  %1198 = vmatmul.mubr.msk.f32.vlgmr.msra.gmra.mxu1 %vm225_vm13, %v965_v48 }
  0xc7   : > { %1203 = vmatpush3.msra.mxu0 %v1341_v4  ;;  %1223 = vmatprep.subr.mxu1 %v1291_v3 }
  0xc8   : > { %1204 = vmatprep.subr.mxu0 %v1291_v3  ;;  %1224 = vmatpush3.msra.mxu1 %v1333_v2 }
  0xc9   : > { %1205 = vmatpush3.msra.mxu0 %v1360_v6  ;;  %1225 = vmatprep.subr.mxu1 %v1291_v3 }
  0xca   : > { %1206 = vmatprep.subr.mxu0 %v1291_v3  ;;  %1226 = vmatpush3.msra.mxu1 %v1341_v4 }
  0xcb   : > { %1207 = vmatpush3.msra.mxu0 %v1373_v7  ;;  %1227 = vmatprep.subr.mxu1 %v1291_v3 }
  0xcc   : > { %1208 = vmatprep.subr.mxu0 %v1291_v3  ;;  %1228 = vmatpush3.msra.mxu1 %v1360_v6 }
  0xcd   : > { %1209 = vmatpush3.msra.mxu0 %v1381_v10  ;;  %1229 = vmatprep.subr.mxu1 %v1291_v3 }
  0xce   : > { %1210 = vmatprep.subr.mxu0 %v1291_v3  ;;  %1230 = vmatpush3.msra.mxu1 %v1373_v7 }
  0xcf   : > { %1211 = vmatpush3.msra.mxu0 %v1392_v13  ;;  %1231 = vmatprep.subr.mxu1 %v1291_v3 }
  0xd0   : > { %1212 = vmatprep.subr.mxu0 %v1291_v3  ;;  %1232 = vmatpush3.msra.mxu1 %v1381_v10 }
  0xd1   : > { %1213 = vmatpush3.msra.mxu0 %v1404_v14  ;;  %1233 = vmatprep.subr.mxu1 %v1291_v3 }
  0xd2   : > { %1214 = vmatprep.subr.mxu0 %v1291_v3  ;;  %1234 = vmatpush3.msra.mxu1 %v1392_v13 }
  0xd3   : > { %1215 = vmatpush3.msra.mxu0 %v1412_v17  ;;  %1235 = vmatprep.subr.mxu1 %v1291_v3 }
  0xd4   : > { %1216 = vmatprep.subr.mxu0 %v1291_v3  ;;  %1236 = vmatpush3.msra.mxu1 %v1404_v14 }
  0xd5   : > { %1217 = vmatpush3.msra.mxu0 %v1420_v18  ;;  %1237 = vmatprep.subr.mxu1 %v1291_v3 }
  0xd6   : > { %1218 = vmatprep.subr.mxu0 %v1291_v3  ;;  %1238 = vmatpush3.msra.mxu1 %v1412_v17 }
  0xd7   : > { %1219 = vmatpush3.msra.mxu0 %v1429_v20  ;;  %1220 = vmatprep.mubr.msk.f32.mxu0 %vm1299_vm0, %v1291_v3 }
  0xd8   : > { %1239 = vmatprep.subr.mxu1 %v1291_v3  ;;  %1221 = vmatmul.mubr.msk.f32.vlgmr.msra.gmra.mxu0 %vm225_vm13, %v967_v49 }
  0xd9   : > { %1240 = vmatpush3.msra.mxu1 %v1420_v18  ;;  %1243 = vmatprep.mubr.msk.f32.mxu1 %vm1299_vm0, %v1291_v3  ;;  %vm880_vm0 = vcmp.lt.s32.totalorder %v1449_v26, 32 }
  0xda   : > { %1241 = vmatprep.subr.mxu1 %v1291_v3 }
  0xdb   : > { %1242 = vmatpush3.msra.mxu1 %v1429_v20 }
  0xdc   : > { %1244 = vmatmul.mubr.msk.f32.vlgmr.msra.gmra.mxu1 %vm225_vm13, %v969_v50 }
 0x159   : > { %v295_v51 = vpop.f32.mrf.mxu0 }
 0x15a   : > { %v378_v52 = vpop.f32.mrf.mxu1  ;;  %v299_v62 = vmax.f32 %v295_v51, -3e+38 }
 0x15b   : > { %v1084_v53 = vpop.f32.mrf.mxu0 }
 0x15c   : > { %v1107_v54 = vpop.f32.mrf.mxu1  ;;  %v382_v0 = vmax.f32 %v299_v62, %v378_v52 }
 0x16d   : > { %v461_v55 = vpop.f32.mrf.mxu0 }
 0x16e   : > { %v465_v1 = vmax.f32 %v382_v0, %v461_v55 }
 0x16f   : > { %v1130_v56 = vpop.f32.mrf.mxu0 }
 0x170   : > { %v544_v57 = vpop.f32.mrf.mxu1 }
 0x171   : > { %v548_v2 = vmax.f32 %v465_v1, %v544_v57 }
 0x172   : > { %v1153_v58 = vpop.f32.mrf.mxu1 }
 0x182   : > { %v627_v59 = vpop.f32.mrf.mxu0 }
 0x183   : > { %v631_v3 = vmax.f32 %v548_v2, %v627_v59 }
 0x184   : > { %v1176_v60 = vpop.f32.mrf.mxu0 }
 0x186   : > { %v710_v61 = vpop.f32.mrf.mxu1 }
 0x187   : > { %v714_v4 = vmax.f32 %v631_v3, %v710_v61 }
 0x188   : > { %v1199_v63 = vpop.f32.mrf.mxu1 }
 0x198   : > { %v793_v5 = vpop.f32.mrf.mxu0 }
 0x199   : > { %v797_v6 = vmax.f32 %v714_v4, %v793_v5 }
 0x19a   : > { %v1222_v7 = vpop.f32.mrf.mxu0 }
 0x19c   : > { %v876_v8 = vpop.f32.mrf.mxu1 }
 0x19d   : > { %v881_v10 = vmax.f32 %v797_v6, %v876_v8 }
 0x19e   : > { %v1245_v11 = vpop.f32.mrf.mxu1 }
 0x19f   : > { %v882_v12 = vsel %vm880_vm0, %v881_v10, %v797_v6 }
 0x1a0   : > { %v889_v13 = vadd.f32 %v971_v9, %v882_v12 }
 0x1a2   : > { %1279 = vtanh.f32 %v889_v13 }
 0x1af   : > { %v1280_v14 = vpop.eup %1279 }
 0x1b0   : > { %891 = vst [vmem:[%s165_s17] sm:$0xff] %v1280_v14 }
 0x1b1 PF: > { %s13_s12 = sadd.s32 1, %s1287_s12  }
 0x1b2   : > { %p10_p4 = scmp.ge.s32.totalorder %s13_s12, 4  }
 0x1b4   :  { %12 = sbr.rel (!%p10_p4) target bundleno = 1 (0x1), region = 62 }

</bundles_post_ra>
